<compile_context>
chip_gen: v6e
topology: v6e:2x2x1
jax: 0.10.0
libtpu: 0.0.40
codegen_flags: <defaults>
</compile_context>

<pallas_src>
import jax
import jax.numpy as jnp
from jax.experimental import pallas as pl
from jax.experimental.pallas import tpu as pltpu


# ---------------------------------------------------------------------------
# Production path: IdentityLoss.forward(loss) -> loss, zero kernel launches.
# ---------------------------------------------------------------------------
def identity_loss(loss):
    """Exact IdentityLoss.forward: return the loss unchanged (no kernel)."""
    return jnp.asarray(loss)


# ---------------------------------------------------------------------------
# Forced-copy paths (testing only).
# ---------------------------------------------------------------------------

# --- path 1: single HBM->HBM DMA, no grid, no VMEM staging -----------------
def _dma_copy_kernel(x_hbm, o_hbm, sem):
    cp = pltpu.make_async_copy(x_hbm, o_hbm, sem)
    cp.start()
    cp.wait()


def _identity_copy_dma(x):
    return pl.pallas_call(
        _dma_copy_kernel,
        out_shape=jax.ShapeDtypeStruct(x.shape, x.dtype),
        in_specs=[pl.BlockSpec(memory_space=pl.ANY)],
        out_specs=pl.BlockSpec(memory_space=pl.ANY),
        scratch_shapes=[pltpu.SemaphoreType.DMA],
    )(x)


# --- path 2: tiled, pipelined, lane-dense VMEM copy -------------------------
_LANE_WIDTHS = (1024, 512, 256, 128)          # preferred lane-dense last dims
_TARGET_TILE_BYTES = 4 * 1024 * 1024          # ~4 MiB blocks (review guidance)
_VMEM_LIMIT_BYTES = 32 * 1024 * 1024          # 2 in + 2 out bufs = 16 MiB + headroom


def _identity_tile_kernel(x_ref, o_ref):
    o_ref[...] = x_ref[...]


def _min_sublane_rows(dtype):
    # Sub-32-bit dtypes pack along sublanes: f32 -> 8, bf16 -> 16, int8/fp8 -> 32.
    itemsize = jnp.dtype(dtype).itemsize
    return 8 * max(1, 4 // max(1, itemsize))


def _identity_copy_tiled(x, *, tile_bytes=_TARGET_TILE_BYTES):
    # Pick a lane-dense column count (multiple of 128) dividing the element count.
    cols = None
    for c in _LANE_WIDTHS:
        if x.size % c == 0:
            cols = c
            break
    if cols is None:
        return None                            # not lane-tileable; caller falls back to DMA

    rows = x.size // cols
    itemsize = jnp.dtype(x.dtype).itemsize
    min_rows = _min_sublane_rows(x.dtype)

    # ~tile_bytes per block, rounded down to the packed-sublane multiple.
    tile_rows = max(min_rows, (tile_bytes // (cols * itemsize)) // min_rows * min_rows)
    if rows <= tile_rows:
        tile_rows = rows                       # full-extent block is always legal

    x2d = x.reshape(rows, cols)                # layout plumbing, outside the kernel
    out2d = pl.pallas_call(
        _identity_tile_kernel,
        out_shape=jax.ShapeDtypeStruct((rows, cols), x2d.dtype),
        grid=(pl.cdiv(rows, tile_rows),),      # ragged last block handled by Pallas
        in_specs=[pl.BlockSpec((tile_rows, cols), lambda i: (i, 0))],
        out_specs=pl.BlockSpec((tile_rows, cols), lambda i: (i, 0)),
        compiler_params=pltpu.CompilerParams(
            dimension_semantics=("parallel",),
            vmem_limit_bytes=_VMEM_LIMIT_BYTES,
        ),
    )(x2d)
    return out2d.reshape(x.shape)


def identity_loss_copy(loss, *, method="dma", tile_bytes=_TARGET_TILE_BYTES):
    """Materialized identity copy through Pallas (testing / validation only)."""
    loss = jnp.asarray(loss)
    if loss.size == 0 or loss.ndim == 0:
        return loss                            # nothing worth copying; identity is exact
    if method == "tiled":
        out = _identity_copy_tiled(loss, tile_bytes=tile_bytes)
        if out is not None:
            return out
        # element count not lane-tileable -> fall through to the DMA copy
    return _identity_copy_dma(loss)


if __name__ == "__main__":
    key = jax.random.PRNGKey(0)
    k1, k2, k3 = jax.random.split(key, 3)

    # Case 1: scalar loss (typical TorchFort usage) -> zero-cost identity, no kernel.
    scalar_loss = jax.random.normal(k1, (), dtype=jnp.float32)
    out_scalar = jax.block_until_ready(identity_loss(scalar_loss))
    assert out_scalar.shape == scalar_loss.shape
    assert out_scalar.dtype == scalar_loss.dtype
    assert jnp.array_equal(out_scalar, scalar_loss)

    # Case 2: empty tensor -> zero-cost identity, no kernel.
    empty = jnp.zeros((0, 4), dtype=jnp.float32)
    out_empty = jax.block_until_ready(identity_loss(empty))
    assert out_empty.shape == empty.shape and out_empty.dtype == empty.dtype

    # Case 3: small tensor, forced copy via single HBM->HBM DMA (no grid, no VMEM).
    x = jax.random.normal(k2, (2, 4, 16, 16), dtype=jnp.float32)
    out_dma = jax.block_until_ready(identity_loss_copy(x, method="dma"))
    assert out_dma.shape == x.shape and out_dma.dtype == x.dtype
    assert jnp.array_equal(out_dma, x)

    # Case 3b: same tensor in bf16 through the tiled path (dtype-aware sublane
    # minimum -> single full-extent lane-dense block).
    x_bf16 = x.astype(jnp.bfloat16)
    out_bf16 = jax.block_until_ready(identity_loss_copy(x_bf16, method="tiled"))
    assert out_bf16.shape == x_bf16.shape and out_bf16.dtype == x_bf16.dtype
    assert jnp.array_equal(out_bf16, x_bf16)

    # Case 4: multi-block pipelined tiled copy with a ragged last block
    # (rows=84, tile_rows=32 via small tile_bytes -> grid=3, last block 20 rows).
    y = jax.random.normal(k3, (84, 1024), dtype=jnp.float32)
    out_tiled = jax.block_until_ready(
        identity_loss_copy(y, method="tiled", tile_bytes=128 * 1024))
    assert out_tiled.shape == y.shape and out_tiled.dtype == y.dtype
    assert jnp.array_equal(out_tiled, y)

    # Case 4b: the production path on the same tensor is a pure pass-through.
    out_y = jax.block_until_ready(identity_loss(y))
    assert jnp.array_equal(out_y, y)

    print("KERNEL_OK")
</pallas_src>

<mosaic_0001>
module attributes {stable_mosaic.version = 11 : i64} {
  func.func @_dma_copy_kernel(%arg0: memref<2x4x16x16xf32, #tpu.memory_space<any>>, %arg1: memref<2x4x16x16xf32, #tpu.memory_space<any>>, %arg2: memref<!tpu.dma_semaphore, #tpu.memory_space<semaphore_mem>>) attributes {dimension_semantics = [], scalar_prefetch = 0 : i64, scratch_operands = 1 : i64, tpu.core_type = #tpu.core_type<tc>} {
    tpu.enqueue_dma source(%arg0 : memref<2x4x16x16xf32, #tpu.memory_space<any>>) target(%arg1 : memref<2x4x16x16xf32, #tpu.memory_space<any>>) target_semaphore(%arg2 : memref<!tpu.dma_semaphore, #tpu.memory_space<semaphore_mem>>)
    tpu.wait_dma2 semaphore(%arg2 : memref<!tpu.dma_semaphore, #tpu.memory_space<semaphore_mem>>) src(%arg0 : memref<2x4x16x16xf32, #tpu.memory_space<any>>) dst(%arg1 : memref<2x4x16x16xf32, #tpu.memory_space<any>>)
    return
  }
}

</mosaic_0001>

<bundles_post_ra>
// kernel: tpu_custom_call.1
= control target key start
LH: loop header
LB: loop body
LE: loop exit
PB: predicated region body
PF: predicated region fallthrough
CT: control target
= control target key end

     0   :  { %s30_s6 = smov [#allocation2]   ;;  %s31_s7 = smov 131072   ;;  %s49_s0 = inlined_call_operand.hbm [shape: f32[2,4,16,16], index: 0, kind: input, shape index: {}]   ;;  %s50_s1 = inlined_call_operand.hbm [shape: f32[2,4,16,16], index: 1, kind: output, shape index: {}]  }
   0x1   :  { %s32_s8 = smov 0  }
   0x2   :  { %12 = dma.general %s49_s0, 2048, %s50_s1, %s30_s6, %s31_s7, [#allocation4], %s32_s8, 0  }
   0x3   :  { %28 = dma.done.wait [#allocation2], 2048 }
   0x4   :  { %29 = vsyncadd [#allocation2], 4294965248 }
   0x5   :  { %18 = vsyncmov [#allocation2] }
   0x8   :  { %s19_s13 = vpop.sfrf %18 }
   0x9   :  { %p24_p0 = scmp.ne.s32.totalorder %s19_s13, 0 }
   0xb   :  { %23 = shalt.err (%p24_p0)  }

</bundles_post_ra>
